<compile_context>
chip_gen: v6e
topology: v6e:2x2x1
jax: 0.10.0
libtpu: 0.0.40
codegen_flags: <defaults>
</compile_context>

<pallas_src>
import jax
import jax.numpy as jnp
from jax.experimental import pallas as pl
from jax.experimental.pallas import tpu as pltpu

HIDDEN = 256  # fixed by the module definition


def _round_up(x, m):
    return ((x + m - 1) // m) * m


def _gen_kernel(x_ref, w1_ref, b1_ref, w2_ref, b2_ref, o_ref):
    """One batch tile of the generator forward pass, fully VMEM-resident.

    x_ref : (TB, Z)        latent inputs for this batch tile
    w1_ref: (Z, 256)       first Linear weight (pre-transposed to (in, out))
    b1_ref: (1, 256)       first Linear bias
    w2_ref: (256, IMG)     second Linear weight (pre-transposed to (in, out))
    b2_ref: (1, IMG)       second Linear bias
    o_ref : (TB, IMG)      tanh output
    """
    # Linear 1 (MXU, f32 accumulate) + bias
    h = jnp.dot(x_ref[...], w1_ref[...],
                preferred_element_type=jnp.float32) + b1_ref[...]
    # LeakyReLU(negative_slope=0.01)
    h = jnp.where(h >= 0, h, 0.01 * h)
    # Linear 2 (MXU, f32 accumulate) + bias
    y = jnp.dot(h, w2_ref[...],
                preferred_element_type=jnp.float32) + b2_ref[...]
    # Tanh (EUP)
    o_ref[...] = jnp.tanh(y).astype(o_ref.dtype)


def prepare_params(w1, b1, w2, b2):
    """One-time layout conversion from PyTorch (out, in) weights.

    Called once at parameter-initialization time so no transpose HBM traffic
    is paid per forward call.
    """
    w1t = jnp.transpose(w1)            # (z_dim, 256)
    w2t = jnp.transpose(w2)            # (256, img_dim)
    b1r = b1.reshape(1, -1)            # (1, 256)
    b2r = b2.reshape(1, -1)            # (1, img_dim)
    return w1t, b1r, w2t, b2r


def generator_forward(x, w1t, b1r, w2t, b2r, *, block_b=512):
    """Generator forward. Expects params from `prepare_params` (kernel layout)."""
    B, Z = x.shape
    H = w1t.shape[1]
    IMG = w2t.shape[1]
    assert H == HIDDEN and b1r.shape == (1, H) and w2t.shape == (H, IMG)

    # Batch tile: large multiple of 8, clamped to the (padded) batch.
    TB = min(_round_up(block_b, 8), _round_up(B, 8))
    Bp = _round_up(B, TB)
    if Bp != B:
        x = jnp.pad(x, ((0, Bp - B), (0, 0)))
    grid = (Bp // TB,)

    # VMEM budget: 2x (double buffer) every operand + output tile, + headroom.
    itm = 4  # float32
    need = 2 * itm * (TB * Z + Z * H + 8 * H + H * IMG + 8 * IMG + TB * IMG)
    vmem_limit = min(max(16 * 1024 * 1024, int(1.5 * need)), 64 * 1024 * 1024)

    out = pl.pallas_call(
        _gen_kernel,
        out_shape=jax.ShapeDtypeStruct((Bp, IMG), jnp.float32),
        grid=grid,
        in_specs=[
            pl.BlockSpec((TB, Z), lambda i: (i, 0)),     # x: tiled over batch
            pl.BlockSpec((Z, H), lambda i: (0, 0)),      # w1: VMEM-resident
            pl.BlockSpec((1, H), lambda i: (0, 0)),      # b1
            pl.BlockSpec((H, IMG), lambda i: (0, 0)),    # w2
            pl.BlockSpec((1, IMG), lambda i: (0, 0)),    # b2
        ],
        out_specs=pl.BlockSpec((TB, IMG), lambda i: (i, 0)),
        compiler_params=pltpu.CompilerParams(
            dimension_semantics=("parallel",),
            vmem_limit_bytes=vmem_limit,
        ),
    )(x, w1t, b1r, w2t, b2r)

    return out[:B] if Bp != B else out


def _reference_forward(x, w1, b1, w2, b2):
    """Pure-JAX reference matching torch semantics (y = x @ W.T + b)."""
    h = x @ w1.T + b1
    h = jnp.where(h >= 0, h, 0.01 * h)
    y = h @ w2.T + b2
    return jnp.tanh(y)


if __name__ == "__main__":
    # Small, deterministic setup: batch=40 (ragged vs 16-row tiles),
    # z_dim=64 (as in the lecture), img_dim=128.
    B, Z_DIM, IMG_DIM = 40, 64, 128

    key = jax.random.PRNGKey(0)
    kx, kw1, kb1, kw2, kb2 = jax.random.split(key, 5)

    x = jax.random.normal(kx, (B, Z_DIM), dtype=jnp.float32)

    # PyTorch nn.Linear parameter shapes: weight (out, in), bias (out,)
    w1 = jax.random.normal(kw1, (HIDDEN, Z_DIM), dtype=jnp.float32) * 0.05
    b1 = jax.random.normal(kb1, (HIDDEN,), dtype=jnp.float32) * 0.05
    w2 = jax.random.normal(kw2, (IMG_DIM, HIDDEN), dtype=jnp.float32) * 0.05
    b2 = jax.random.normal(kb2, (IMG_DIM,), dtype=jnp.float32) * 0.05

    # One-time layout prep (transpose hoisted out of the hot path).
    w1t, b1r, w2t, b2r = prepare_params(w1, b1, w2, b2)

    out = generator_forward(x, w1t, b1r, w2t, b2r, block_b=16)
    out = jax.block_until_ready(out)

    ref = _reference_forward(x, w1, b1, w2, b2)
    assert out.shape == (B, IMG_DIM), out.shape
    assert jnp.allclose(out, ref, atol=1e-3, rtol=1e-3), "mismatch vs reference"

    print("KERNEL_OK")
</pallas_src>

<mosaic_0001>
module attributes {stable_mosaic.version = 11 : i64} {
  func.func @_gen_kernel(%arg0: i32, %arg1: memref<16x64xf32, #tpu.memory_space<vmem>>, %arg2: memref<64x256xf32, #tpu.memory_space<vmem>>, %arg3: memref<1x256xf32, #tpu.memory_space<vmem>>, %arg4: memref<256x128xf32, #tpu.memory_space<vmem>>, %arg5: memref<1x128xf32, #tpu.memory_space<vmem>>, %arg6: memref<16x128xf32, #tpu.memory_space<vmem>>) attributes {dimension_semantics = [#tpu.dimension_semantics<parallel>], iteration_bounds = array<i64: 3>, scalar_prefetch = 0 : i64, scratch_operands = 0 : i64, tpu.core_type = #tpu.core_type<tc>, window_params = [{transform_indices = @transform_0, window_bounds = array<i64: 16, 64>}, {pipeline_mode = #tpu.pipeline_mode<synchronous>, transform_indices = @transform_1, window_bounds = array<i64: 64, 256>}, {pipeline_mode = #tpu.pipeline_mode<synchronous>, transform_indices = @transform_2, window_bounds = array<i64: 1, 256>}, {pipeline_mode = #tpu.pipeline_mode<synchronous>, transform_indices = @transform_3, window_bounds = array<i64: 256, 128>}, {pipeline_mode = #tpu.pipeline_mode<synchronous>, transform_indices = @transform_4, window_bounds = array<i64: 1, 128>}, {transform_indices = @transform_5, window_bounds = array<i64: 16, 128>}]} {
    %c0 = arith.constant 0 : index
    %c0_0 = arith.constant 0 : index
    %0 = vector.load %arg1[%c0, %c0_0] : memref<16x64xf32, #tpu.memory_space<vmem>>, vector<16x64xf32>
    %c0_1 = arith.constant 0 : index
    %c0_2 = arith.constant 0 : index
    %1 = vector.load %arg2[%c0_1, %c0_2] : memref<64x256xf32, #tpu.memory_space<vmem>>, vector<64x256xf32>
    %cst = arith.constant dense<0.000000e+00> : vector<16x256xf32>
    %2 = tpu.matmul %0, %1, %cst {dimension_numbers = #tpu.dot_dimension_numbers<[1], [0], [0], [1], [0, 0, 1, 1], [], []>} : vector<16x64xf32>, vector<64x256xf32>, vector<16x256xf32> -> vector<16x256xf32>
    %c0_3 = arith.constant 0 : index
    %c0_4 = arith.constant 0 : index
    %3 = vector.load %arg3[%c0_3, %c0_4] : memref<1x256xf32, #tpu.memory_space<vmem>>, vector<1x256xf32>
    %4 = vector.broadcast %3 : vector<1x256xf32> to vector<16x256xf32>
    %5 = arith.addf %2, %4 : vector<16x256xf32>
    %cst_5 = arith.constant 0.000000e+00 : f32
    %6 = vector.broadcast %cst_5 : f32 to vector<16x256xf32>
    %7 = arith.cmpf oge, %5, %6 : vector<16x256xf32>
    %cst_6 = arith.constant 0.00999999977 : f32
    %8 = vector.broadcast %cst_6 : f32 to vector<16x256xf32>
    %9 = arith.mulf %8, %5 : vector<16x256xf32>
    %10 = arith.select %7, %5, %9 : vector<16x256xi1>, vector<16x256xf32>
    %c0_7 = arith.constant 0 : index
    %c0_8 = arith.constant 0 : index
    %11 = vector.load %arg4[%c0_7, %c0_8] : memref<256x128xf32, #tpu.memory_space<vmem>>, vector<256x128xf32>
    %cst_9 = arith.constant dense<0.000000e+00> : vector<16x128xf32>
    %12 = tpu.matmul %10, %11, %cst_9 {dimension_numbers = #tpu.dot_dimension_numbers<[1], [0], [0], [1], [0, 0, 1, 1], [], []>} : vector<16x256xf32>, vector<256x128xf32>, vector<16x128xf32> -> vector<16x128xf32>
    %c0_10 = arith.constant 0 : index
    %c0_11 = arith.constant 0 : index
    %13 = vector.load %arg5[%c0_10, %c0_11] : memref<1x128xf32, #tpu.memory_space<vmem>>, vector<1x128xf32>
    %14 = vector.broadcast %13 : vector<1x128xf32> to vector<16x128xf32>
    %15 = arith.addf %12, %14 : vector<16x128xf32>
    %16 = math.tanh %15 : vector<16x128xf32>
    %c0_12 = arith.constant 0 : index
    %c0_13 = arith.constant 0 : index
    %17 = vector.load %arg6[%c0_12, %c0_13] : memref<16x128xf32, #tpu.memory_space<vmem>>, vector<16x128xf32>
    tpu.vector_store %arg6[%c0_12, %c0_13], %16 {strides = array<i32>} : memref<16x128xf32, #tpu.memory_space<vmem>>, vector<16x128xf32>,
    return
  }
  func.func @transform_0(%arg0: i32) -> (i32, i32) {
    %c0_i32 = arith.constant 0 : i32
    %c0_i32_0 = arith.constant 0 : i32
    return %arg0, %c0_i32 : i32, i32
  }
  func.func @transform_1(%arg0: i32) -> (i32, i32) {
    %c0_i32 = arith.constant 0 : i32
    %c0_i32_0 = arith.constant 0 : i32
    %c0_i32_1 = arith.constant 0 : i32
    return %c0_i32, %c0_i32_0 : i32, i32
  }
  func.func @transform_2(%arg0: i32) -> (i32, i32) {
    %c0_i32 = arith.constant 0 : i32
    %c0_i32_0 = arith.constant 0 : i32
    %c0_i32_1 = arith.constant 0 : i32
    return %c0_i32, %c0_i32_0 : i32, i32
  }
  func.func @transform_3(%arg0: i32) -> (i32, i32) {
    %c0_i32 = arith.constant 0 : i32
    %c0_i32_0 = arith.constant 0 : i32
    %c0_i32_1 = arith.constant 0 : i32
    return %c0_i32, %c0_i32_0 : i32, i32
  }
  func.func @transform_4(%arg0: i32) -> (i32, i32) {
    %c0_i32 = arith.constant 0 : i32
    %c0_i32_0 = arith.constant 0 : i32
    %c0_i32_1 = arith.constant 0 : i32
    return %c0_i32, %c0_i32_0 : i32, i32
  }
  func.func @transform_5(%arg0: i32) -> (i32, i32) {
    %c0_i32 = arith.constant 0 : i32
    %c0_i32_0 = arith.constant 0 : i32
    return %arg0, %c0_i32 : i32, i32
  }
}

</mosaic_0001>

<bundles_post_ra>
// kernel: tpu_custom_call.1
= control target key start
LH: loop header
LB: loop body
LE: loop exit
PB: predicated region body
PF: predicated region fallthrough
CT: control target
= control target key end

     0   :  { %10 = vsyncpa [#allocation3], 0  ;;  %s1162_s0 = inlined_call_operand.hbm [shape: f32[48,64], index: 0, kind: input, shape index: {}]   ;;  %s1163_s1 = inlined_call_operand.hbm [shape: f32[64,256], index: 1, kind: input, shape index: {}]   ;;  %s1164_s2 = inlined_call_operand.vmem [shape: f32[1,256], index: 2, kind: input, shape index: {}]   ;;  %s1165_s3 = inlined_call_operand.hbm [shape: f32[256,128], index: 3, kind: input, shape index: {}]   ;;  %s1166_s4 = inlined_call_operand.vmem [shape: f32[1,128], index: 4, kind: input, shape index: {}]   ;;  %s1167_s5 = inlined_call_operand.hbm [shape: f32[48,128], index: 5, kind: output, shape index: {}]  }
   0x1   :  { %12 = vsyncpa [#allocation3 + $0x1], 0 }
   0x2   :  { %13 = vsyncpa [#allocation6], 0 }
   0x3   :  { %14 = vsyncpa [#allocation4], 0 }
   0x4   :  { %16 = vsyncpa [#allocation4 + $0x1], 0  ;;  %s954_s18 = smov 0   ;;  %s956_s19 = smov 0  }
   0x5   :  { %s958_s20 = smov 0   ;;  %s960_s21 = smov 0  }
   0x6 LB: > { %s975_s22 = sadd.s32 4294967295, %s911_s21   ;;  %s624_s23 = sadd.s32 4294967294, %s911_s21   ;;  %s911_s21 = sphi %s960_s21, %s1190_s21   ;;  %s907_s20 = sphi %s958_s20, %s1189_s20   ;;  %s903_s19 = sphi %s956_s19, %s1188_s19   ;;  %s899_s18 = sphi %s954_s18, %s1187_s18  }
   0x7   : > { %p42_p0 = scmp.ne.s32.totalorder %s903_s19, %s899_s18  ;;  %p1168_p1 = scmp.eq.s32.totalorder %s975_s22, 0 }
   0x8   : > { %p156_p3 = scmp.eq.s32.totalorder %s624_s23, 2  ;;  %p625_p5 = scmp.ge.s32.totalorder %s911_s21, 1 }
   0x9   : > { %p984_p4 = por %p1168_p1, %p42_p0  ;;  %p163_p7 = scmp.lt.s32.totalorder %s911_s21, 4 }
   0xa   : > { %p989_p6 = por %p156_p3, %p42_p0  ;;  %s913_s27 = smov [#allocation5]  }
   0xb   : > { %s1173_s24 = scalar_select %p984_p4, 1, 0 }
   0xc   : > { %s1174_s25 = scalar_select %p989_p6, 1, 0 }
   0xd   : > { %p994_p8 = pnand %p625_p5, %p163_p7  ;;  %s175_s28 = sshll.u32 %s913_s27, 4  ;;  %s176_s28 = int_to_ptr.vmem [resolvable:$true] %s175_s28 }
   0xe   : > { %s914_s30 = smov [#allocation7]   ;;  %s774_s7 = scalar_lea.vmem %s176_s28, 2048 }
   0xf   : > { %s1175_s26 = scalar_select %p994_p8, 1, 0 }
  0x10   : > { %p697_p9 = pneg %p994_p8  ;;  %s191_s6 = sshll.u32 %s914_s30, 4  ;;  %s192_s6 = int_to_ptr.vmem [resolvable:$true] %s191_s6 }
  0x11   : > { %p775_p12 = scmp.ne.s32.totalorder %s176_s28, %s774_s7  ;;  %p782_p3 = scmp.lt.s32.totalorder %s176_s28, %s176_s28 }
  0x12   : > { %p1002_p10 = pnand %p697_p9, %p1168_p1  ;;  %p783_p5 = scmp.lt.s32.totalorder %s774_s7, %s774_s7 }
  0x14   : > { %p765_p11 = pneg %p1002_p10  ;;  %p784_p7 = por %p783_p5, %p782_p3 }
  0x16   : > { %p777_p13 = pnand %p775_p12, %p765_p11 }
  0x18   : > { %p778_p0 = pneg %p777_p13 }
  0x1a   : > { %p785_p9 = pnand %p784_p7, %p778_p0 }
  0x1c   : > { %788 = shalt.err (!%p785_p9)
}
  0x1d   : > { %s915_s8 = smov 256   ;;  %s916_s9 = smov 16  }
  0x1e   : > { %700 = dma.hbm_to_vmem [thread:$0]  (!%p1002_p10), %s1163_s1, 2048, %s176_s28, [#allocation6], %s915_s8, %s915_s8, %s916_s9  }
  0x1f   : > { %s800_s12 = scalar_lea.vmem %s192_s6, 4096  ;;  %p808_p2 = scmp.lt.s32.totalorder %s192_s6, %s192_s6 }
  0x20   : > { %p801_p1 = scmp.ne.s32.totalorder %s192_s6, %s800_s12  ;;  %p809_p6 = scmp.lt.s32.totalorder %s800_s12, %s800_s12 }
  0x22   : > { %p803_p12 = pnand %p801_p1, %p765_p11  ;;  %p810_p3 = por %p809_p6, %p808_p2 }
  0x24   : > { %p804_p13 = pneg %p803_p12 }
  0x26   : > { %p811_p0 = pnand %p810_p3, %p804_p13 }
  0x28   : > { %814 = shalt.err (!%p811_p0)
}
  0x29   : > { %s1169_s13 = smov 128   ;;  %s918_s14 = smov 8  }
  0x2a   : > { %703 = dma.hbm_to_vmem [thread:$0]  (!%p1002_p10), %s1165_s3, 4096, %s192_s6, [#allocation6], %s1169_s13, %s1169_s13, %s918_s14  }
  0x2b   : > { %s1028_s17 = sadd.s32 1, %s911_s21   ;;  %s29_s27 = sadd.s32 1, %s907_s20 }
  0x2c   : > { %s26_s23 = ssub.s32 %s911_s21, %s1028_s17  ;;  %p36_p2 = scmp.ne.s32.totalorder %s907_s20, %s903_s19 }
  0x2d   : > { %p27_p1 = scmp.eq.s32.totalorder %s26_s23, 0  ;;  %p37_p6 = scmp.eq.s32.totalorder %s911_s21, 0 }
  0x2e   : > { %p1177_p5 = scmp.eq.s32.totalorder %s975_s22, 2  ;;  %p714_p9 = scmp.lt.s32.totalorder %s911_s21, 3 }
  0x2f   : > { %s1037_s28 = scalar_select %p27_p1, %s907_s20, %s29_s27  }
  0x30   : > { %p38_p11 = por %p37_p6, %p36_p2  ;;  %p1041_p7 = por %p1177_p5, %p36_p2 }
  0x31   : > { %s208_s30 = sand.u32 1, %s907_s20   ;;  %s645_s6 = sshll.u32 %s911_s21, 8 }
  0x32   : > { %s1178_s29 = scalar_select %p1041_p7, 1, 0 }
  0x33   : > { %s629_s7 = sshll.u32 %s208_s30, 4  ;;  %s1051_s10 = scalar_lea.hbm %s1162_s0, %s645_s6 }
  0x34   : > { %s212_s11 = scalar_lea.vmem [#allocation2], %s629_s7  ;;  %p1055_p10 = pnand %p714_p9, %p38_p11 }
  0x35   : > { %s219_s12 = sshll.u32 %s212_s11, 4  ;;  %s1059_s16 = scalar_lea.sflag [#allocation3], %s208_s30  ;;  %s1053_s12 = int_to_ptr.vmem [resolvable:$true] %s219_s12 }
  0x36   : > { %s815_s23 = scalar_lea.hbm %s1051_s10, 256  ;;  %p817_p13 = pneg %p1055_p10 }
  0x37   : > { %p816_p12 = scmp.ne.s32.totalorder %s1051_s10, %s815_s23  ;;  %s820_s7 = scalar_lea.hbm %s1162_s0, 768 }
  0x38   : > { %p821_p1 = scmp.lt.s32.totalorder %s1051_s10, %s1162_s0  ;;  %p822_p2 = scmp.lt.s32.totalorder %s820_s7, %s815_s23 }
  0x39   : > { %p818_p3 = pnand %p817_p13, %p816_p12 }
  0x3a   : > { %p823_p6 = por %p822_p2, %p821_p1 }
  0x3b   : > { %p819_p0 = pneg %p818_p3 }
  0x3d   : > { %p824_p11 = pnand %p823_p6, %p819_p0 }
  0x3f   : > { %827 = shalt.err (!%p824_p11)
}
  0x40   : > { %s828_s30 = scalar_lea.vmem %s1053_s12, 256  ;;  %s919_s11 = smov [#allocation2]  }
  0x41   : > { %p829_p5 = scmp.ne.s32.totalorder %s1053_s12, %s828_s30  ;;  %s833_s13 = sshll.u32 %s919_s11, 4  ;;  %s834_s13 = int_to_ptr.vmem [resolvable:$false] %s833_s13 }
  0x42   : > { %s835_s27 = scalar_lea.vmem %s834_s13, 512  ;;  %p836_p3 = scmp.lt.s32.totalorder %s1053_s12, %s834_s13 }
  0x43   : > { %p831_p9 = pnand %p829_p5, %p817_p13  ;;  %p837_p7 = scmp.lt.s32.totalorder %s835_s27, %s828_s30 }
  0x45   : > { %p832_p12 = pneg %p831_p9  ;;  %p838_p4 = por %p837_p7, %p836_p3 }
  0x47   : > { %p839_p8 = pnand %p838_p4, %p832_p12 }
  0x49   : > { %842 = shalt.err (!%p839_p8)
}
  0x4a   : > { %s1180_s23 = smov 128   ;;  %p1181_p13 = scmp.ne.s32.totalorder %s1175_s26, 0 }
  0x4b   : > { %707 = dma.hbm_to_vmem [thread:$0]  (!%p1055_p10), %s1051_s10, 256, %s1053_s12, %s1059_s16, %s1180_s23, %s1180_s23, %s918_s14  }
  0x4c   : > { %231 = sbr.rel (%p1181_p13) target bundleno = 534 (0x216), region = 40  ;;  %s1086_s6 = sand.u32 (!%p1181_p13), 1, %s903_s19  }
  0x4d   : > { %s633_s13 = sshll.u32 (!%p1181_p13), %s1086_s6, 4  ;;  %s234_s7 = scalar_lea.sflag (!%p1181_p13), [#allocation3], %s1086_s6 }
  0x4e   : > { %s1092_s15 = scalar_lea.vmem (!%p1181_p13), [#allocation2], %s633_s13  ;;  %p1182_p4 = scmp.ne.s32.totalorder (!%p1181_p13), %s1173_s24, 0 }
  0x51   : > { %886 = dma.done.wait (%p1182_p4), %s234_s7, 256  }
  0x52   : > { %888 = vsyncadd (%p1182_p4), %s234_s7, 4294967040  ;;  %p1183_p8 = scmp.eq.s32.totalorder %s975_s22, 0 }
  0x54   : > { %890 = dma.done.wait (%p1183_p8), [#allocation6], 6144   ;;  %p1184_p7 = pmov %p1183_p8 }
  0x55   : > { %v920_v0 = vmov 0.0   ;;  %v291_v1 = vld [vmem:[#allocation5 + $0x78] sm:$0xff]  ;;  %v290_v2 = vld [vmem:[#allocation5 + $0x70] sm:$0xff]  ;;  %v289_v3 = vld [vmem:[#allocation5 + $0x68] sm:$0xff]  ;;  %vm304_vm0 = vcmask 523264   ;;  %v294_v51 = vlaneseq  ;;  %s646_s12 = sshll.u32 %s975_s22, 8 }
  0x56   : > { %892 = vsyncadd (%p1184_p7), [#allocation6], 4294961152  ;;  %375 = vmatprep.mubr.f32.mxu0 %v920_v0  ;;  %327 = vmatprep.subr.mxu0 %v291_v1  ;;  %v288_v4 = vld [vmem:[#allocation5 + $0x60] sm:$0xff]  ;;  %v287_v5 = vld [vmem:[#allocation5 + $0x58] sm:$0xff]  ;;  %s271_s16 = scalar_lea.vmem [#allocation8], %s633_s13  ;;  %s1118_s11 = scalar_lea.hbm %s1167_s5, %s646_s12 }
  0x57   : > { %328 = vmatpush1.msra.mxu0 %v290_v2  ;;  %v286_v6 = vld [vmem:[#allocation5 + $0x50] sm:$0xff]  ;;  %v285_v7 = vld [vmem:[#allocation5 + $0x48] sm:$0xff]  ;;  %v284_v8 = vld [vmem:[#allocation5 + $0x40] sm:$0xff]  ;;  %v295_v52 = vshrl.u32 %v294_v51, 7  ;;  %s532_s8 = sshll.u32 %s271_s16, 4  ;;  %s519_s27 = scalar_lea.sflag [#allocation4], %s1086_s6  ;;  %s1120_s8 = int_to_ptr.vmem [resolvable:$true] %s532_s8 }
  0x58   : > { %329 = vmatprep.subr.mxu0 %v289_v3  ;;  %v283_v9 = vld [vmem:[#allocation5 + $0x38] sm:$0xff]  ;;  %v430_v12 = vld [vmem:[#allocation7 + $0xf0] sm:$0xff]  ;;  %v281_v15 = vld [vmem:[#allocation5 + $0x28] sm:$0xff]  ;;  %s843_s23 = scalar_lea.vmem %s1120_s8, 256  ;;  %p1185_p0 = scmp.ne.s32.totalorder %s1178_s29, 0 }
  0x59   : > { %330 = vmatpush1.msra.mxu0 %v288_v4  ;;  %v431_v10 = vld [vmem:[#allocation7 + $0xf8] sm:$0xff]  ;;  %v282_v13 = vld [vmem:[#allocation5 + $0x30] sm:$0xff]  ;;  %v429_v16 = vld [vmem:[#allocation7 + $0xe8] sm:$0xff]  ;;  %v296_v53 = vsub.s32 0, %v295_v52  ;;  %v300_v55 = vsub.s32 1, %v295_v52  ;;  %p844_p10 = scmp.ne.s32.totalorder %s1120_s8, %s843_s23  ;;  %s921_s22 = smov [#allocation8]  }
  0x5a   : > { %331 = vmatprep.subr.mxu0 %v287_v5  ;;  %v415_v11 = vld [vmem:[#allocation7 + $0x78] sm:$0xff]  ;;  %647 = vmatprep.subr.mxu1 %v431_v10  ;;  %v414_v14 = vld [vmem:[#allocation7 + $0x70] sm:$0xff]  ;;  %v280_v17 = vld [vmem:[#allocation5 + $0x20] sm:$0xff]  ;;  %s847_s13 = sshll.u32 %s921_s22, 4  ;;  %s848_s13 = int_to_ptr.vmem [resolvable:$false] %s847_s13 }
  0x5b   : > { %332 = vmatpush1.msra.mxu0 %v286_v6  ;;  %648 = vmatpush3.msra.mxu1 %v415_v11  ;;  %v413_v18 = vld [vmem:[#allocation7 + $0x68] sm:$0xff]  ;;  %v279_v19 = vld [vmem:[#allocation5 + $0x18] sm:$0xff]  ;;  %v428_v20 = vld [vmem:[#allocation7 + $0xe0] sm:$0xff]  ;;  %p845_p1 = pnand %p844_p10, %p1185_p0  ;;  %s849_s7 = scalar_lea.vmem %s848_s13, 512 }
  0x5c   : > { %333 = vmatprep.subr.mxu0 %v285_v7  ;;  %649 = vmatprep.subr.mxu1 %v430_v12  ;;  %v278_v21 = vld [vmem:[#allocation5 + $0x10] sm:$0xff]  ;;  %v412_v22 = vld [vmem:[#allocation7 + $0x60] sm:$0xff]  ;;  %v277_v23 = vld [vmem:[#allocation5 + $0x8] sm:$0xff]  ;;  %p850_p6 = scmp.lt.s32.totalorder %s1120_s8, %s848_s13  ;;  %p851_p11 = scmp.lt.s32.totalorder %s849_s7, %s843_s23 }
  0x5d   : > { %334 = vmatpush1.msra.mxu0 %v284_v8  ;;  %650 = vmatpush3.msra.mxu1 %v414_v14  ;;  %v427_v24 = vld [vmem:[#allocation7 + $0xd8] sm:$0xff]  ;;  %v276_v25 = vld [vmem:[#allocation5] sm:$0xff]  ;;  %v426_v28 = vld [vmem:[#allocation7 + $0xd0] sm:$0xff]  ;;  %p846_p2 = pneg %p845_p1 }
  0x5e   : > { %335 = vmatprep.subr.mxu0 %v283_v9  ;;  %651 = vmatprep.subr.mxu1 %v429_v16  ;;  %v411_v26 = vld [vmem:[#allocation7 + $0x58] sm:$0xff]  ;;  %v274_v27 = vld [vmem:[%s1092_s15] sm:$0xff]  ;;  %v425_v30 = vld [vmem:[#allocation7 + $0xc8] sm:$0xff]  ;;  %p852_p5 = por %p851_p11, %p850_p6 }
  0x5f   : > { %336 = vmatpush1.msra.mxu0 %v282_v13  ;;  %652 = vmatpush3.msra.mxu1 %v413_v18  ;;  %v410_v29 = vld [vmem:[#allocation7 + $0x50] sm:$0xff]  ;;  %v409_v31 = vld [vmem:[#allocation7 + $0x48] sm:$0xff]  ;;  %v424_v33 = vld [vmem:[#allocation7 + $0xc0] sm:$0xff] }
  0x60   : > { %337 = vmatprep.subr.mxu0 %v281_v15  ;;  %653 = vmatprep.subr.mxu1 %v428_v20  ;;  %v275_v32 = vld [vmem:[%s1092_s15 + $0x8] sm:$0xff]  ;;  %v408_v34 = vld [vmem:[#allocation7 + $0x40] sm:$0xff]  ;;  %v422_v37 = vld [vmem:[#allocation7 + $0xb0] sm:$0xff]  ;;  %p853_p9 = pnand %p852_p5, %p846_p2 }
  0x61   : > { %338 = vmatpush1.msra.mxu0 %v280_v17  ;;  %654 = vmatpush3.msra.mxu1 %v412_v22  ;;  %v423_v35 = vld [vmem:[#allocation7 + $0xb8] sm:$0xff]  ;;  %v406_v38 = vld [vmem:[#allocation7 + $0x30] sm:$0xff]  ;;  %v421_v39 = vld [vmem:[#allocation7 + $0xa8] sm:$0xff] }
  0x62   : > { %339 = vmatprep.subr.mxu0 %v279_v19  ;;  %655 = vmatprep.subr.mxu1 %v427_v24  ;;  %v407_v36 = vld [vmem:[#allocation7 + $0x38] sm:$0xff]  ;;  %v405_v40 = vld [vmem:[#allocation7 + $0x28] sm:$0xff]  ;;  %v420_v41 = vld [vmem:[#allocation7 + $0xa0] sm:$0xff] }
  0x63   : > { %340 = vmatpush1.msra.mxu0 %v278_v21  ;;  %656 = vmatpush3.msra.mxu1 %v411_v26  ;;  %v404_v42 = vld [vmem:[#allocation7 + $0x20] sm:$0xff]  ;;  %v419_v43 = vld [vmem:[#allocation7 + $0x98] sm:$0xff]  ;;  %v418_v45 = vld [vmem:[#allocation7 + $0x90] sm:$0xff] }
  0x64   : > { %341 = vmatprep.subr.mxu0 %v277_v23  ;;  %657 = vmatprep.subr.mxu1 %v426_v28  ;;  %v403_v44 = vld [vmem:[#allocation7 + $0x18] sm:$0xff]  ;;  %v402_v46 = vld [vmem:[#allocation7 + $0x10] sm:$0xff]  ;;  %v417_v47 = vld [vmem:[#allocation7 + $0x88] sm:$0xff] }
  0x65   : > { %342 = vmatpush1.msra.mxu0 %v276_v25  ;;  %658 = vmatpush3.msra.mxu1 %v410_v29  ;;  %v401_v48 = vld [vmem:[#allocation7 + $0x8] sm:$0xff]  ;;  %v416_v49 = vld [vmem:[#allocation7 + $0x80] sm:$0xff] }
  0x66   : > { %637 = vmatmul.mubr.msk.f32.vlgmr.msra.gmra.mxu0 %vm304_vm0, %v274_v27  ;;  %659 = vmatprep.subr.mxu1 %v425_v30  ;;  %v400_v50 = vld [vmem:[#allocation7] sm:$0xff] }
  0x67   : > { %381 = vmatprep.mubr.f32.mxu0 %v920_v0  ;;  %660 = vmatpush3.msra.mxu1 %v409_v31  ;;  %v292_v54 = vld [vmem:[%s1164_s2] sm:$0x3] }
  0x68   : > { %661 = vmatprep.subr.mxu1 %v424_v33  ;;  %v297_v56 = vrot.slane %v292_v54, %v296_v53  ;;  %v301_v57 = vrot.slane %v292_v54, %v300_v55  ;;  %v639_v11 = vld [vmem:[%s1166_s4] ss:$0 sm:$0xff] }
  0x69   : > { %662 = vmatpush3.msra.mxu1 %v408_v34 }
  0x6a   : > { %638 = vmatmul.mubr.msk.f32.gmra.mxu0 %vm304_vm0, %v275_v32  ;;  %663 = vmatprep.subr.mxu1 %v423_v35 }
  0x6b   : > { %664 = vmatpush3.msra.mxu1 %v407_v36 }
  0x6c   : > { %665 = vmatprep.subr.mxu1 %v422_v37 }
  0x6d   : > { %666 = vmatpush3.msra.mxu1 %v406_v38 }
  0x6e   : > { %667 = vmatprep.subr.mxu1 %v421_v39 }
  0x6f   : > { %668 = vmatpush3.msra.mxu1 %v405_v40 }
  0x70   : > { %669 = vmatprep.subr.mxu1 %v420_v41 }
  0x71   : > { %670 = vmatpush3.msra.mxu1 %v404_v42 }
  0x72   : > { %671 = vmatprep.subr.mxu1 %v419_v43 }
  0x73   : > { %672 = vmatpush3.msra.mxu1 %v403_v44 }
  0x74   : > { %673 = vmatprep.subr.mxu1 %v418_v45 }
  0x75   : > { %674 = vmatpush3.msra.mxu1 %v402_v46 }
  0x76   : > { %675 = vmatprep.subr.mxu1 %v417_v47 }
  0x77   : > { %676 = vmatpush3.msra.mxu1 %v401_v48 }
  0x78   : > { %677 = vmatprep.subr.mxu1 %v416_v49 }
  0x79   : > { %678 = vmatpush3.msra.mxu1 %v400_v50 }
 0x126   : > { %v377_v58 = vpop.f32.mrf.mxu0 }
 0x127   : > { %v378_v59 = vadd.f32 %v377_v58, %v297_v56 }
 0x128   : > { %v379_v60 = vpop.f32.mrf.mxu0 }
 0x129   : > { %v380_v61 = vadd.f32 %v379_v60, %v301_v57  ;;  %v392_v62 = vmul.f32 0.01, %v378_v59  ;;  %vm388_vm2 = vcmp.ge.f32.partialorder %v378_v59, 0.0 }
 0x12a   : > { %v383_v63 = vpop.f32.mrf.mxu0 }
 0x12b   : > { %v384_v0 = vadd.f32 %v383_v63, %v297_v56  ;;  %vm389_vm1 = vcmp.ge.f32.partialorder %v380_v61, 0.0  ;;  %v393_v1 = vmul.f32 0.01, %v380_v61  ;;  %v396_v6 = vsel %vm388_vm2, %v378_v59, %v392_v62 }
 0x12c   : > { %v385_v2 = vpop.f32.mrf.mxu0 }
 0x12d   : > { %v386_v3 = vadd.f32 %v385_v2, %v301_v57  ;;  %v397_v4 = vsel %vm389_vm1, %v380_v61, %v393_v1  ;;  %v394_v5 = vmul.f32 0.01, %v384_v0  ;;  %vm390_vm4 = vcmp.ge.f32.partialorder %v384_v0, 0.0 }
 0x12e   : > { %503 = vmatprep.mubr.f32.mxu1 %v397_v4 }
 0x12f   : > { %v395_v7 = vmul.f32 0.01, %v386_v3  ;;  %504 = vmatmul.mubr.f32.vlgmr.msra.gmra.mxu1 %v396_v6  ;;  %vm391_vm3 = vcmp.ge.f32.partialorder %v386_v3, 0.0  ;;  %v398_v9 = vsel %vm390_vm4, %v384_v0, %v394_v5 }
 0x131   : > { %v399_v8 = vsel %vm391_vm3, %v386_v3, %v395_v7 }
 0x132   : > { %508 = vmatprep.mubr.f32.mxu1 %v399_v8 }
 0x133   : > { %509 = vmatmul.mubr.f32.gmra.mxu1 %v398_v9 }
 0x1ef   : > { %v679_v10 = vpop.f32.mrf.mxu1 }
 0x1f1   : > { %v680_v12 = vpop.f32.mrf.mxu1 }
 0x1f2   : > { %v681_v13 = vadd.f32 %v680_v12, %v679_v10 }
 0x1f3   : > { %v682_v14 = vpop.f32.mrf.mxu1 }
 0x1f4   : > { %v506_v15 = vadd.f32 %v681_v13, %v639_v11 }
 0x1f5   : > { %v683_v16 = vpop.f32.mrf.mxu1 }
 0x1f6   : > { %759 = vtanh.f32 %v506_v15  ;;  %v684_v17 = vadd.f32 %v683_v16, %v682_v14 }
 0x1f8   : > { %v511_v18 = vadd.f32 %v684_v17, %v639_v11 }
 0x1fa   : > { %761 = vtanh.f32 %v511_v18 }
 0x203   : > { %v760_v19 = vpop.eup %759 }
 0x204   : > { %516 = vst [vmem:[%s271_s16] sm:$0xff] %v760_v19 }
 0x207   : > { %v762_v20 = vpop.eup %761 }
 0x208   : > { %517 = vst [vmem:[%s271_s16 + $0x8] sm:$0xff] %v762_v20 }
 0x209   : > { %856 = shalt.err (!%p853_p9)
}
 0x20a   : > { %s857_s15 = scalar_lea.hbm %s1118_s11, 256  ;;  %s861_s14 = scalar_lea.hbm %s1167_s5, 768 }
 0x20b   : > { %p858_p12 = scmp.ne.s32.totalorder %s1118_s11, %s857_s15  ;;  %p862_p4 = scmp.lt.s32.totalorder %s1118_s11, %s1167_s5 }
 0x20c   : > { %p863_p8 = scmp.lt.s32.totalorder %s861_s14, %s857_s15 }
 0x20d   : > { %p859_p3 = pnand %p858_p12, %p1185_p0 }
 0x20e   : > { %p864_p7 = por %p863_p8, %p862_p4 }
 0x20f   : > { %p860_p13 = pneg %p859_p3 }
 0x211   : > { %p865_p10 = pnand %p864_p7, %p860_p13 }
 0x213   : > { %868 = shalt.err (!%p865_p10)
}
 0x214   : > { %s922_s16 = smov 128   ;;  %s923_s9 = smov 8  }
 0x215   : > { %695 = dma.vmem_to_hbm [thread:$0]  (%p1185_p0), %s1120_s8, 256, %s1118_s11, %s519_s27, %s922_s16, %s922_s16, %s923_s9  }
 0x216 PF: > { %p717_p1 = scmp.ge.s32.totalorder %s911_s21, 2  ;;  %s547_s30 = sand.u32 1, %s899_s18  }
 0x217   : > { %p1186_p2 = scmp.ne.s32.totalorder %s1174_s25, 0  ;;  %s548_s23 = scalar_lea.sflag [#allocation4], %s547_s30 }
 0x219   : > { %p709_p6 = pnand %p717_p1, %p1186_p2 }
 0x21b   : > { %p710_p11 = pneg %p709_p6 }
 0x21d   : > { %894 = dma.done.wait (%p710_p11), %s548_s23, 256  }
 0x21e   : > { %896 = vsyncadd (%p710_p11), %s548_s23, 4294967040  ;;  %p19_p5 = scmp.ge.s32.totalorder %s1028_s17, 5   ;;  %s1187_s18 = smov %s903_s19 }
 0x21f   : > { %s1188_s19 = smov %s907_s20  ;;  %s1189_s20 = smov %s1037_s28 }
 0x220   : > { %s1190_s21 = smov %s1028_s17  ;;  %21 = sbr.rel (!%p19_p5) target bundleno = 6 (0x6), region = 93 }
 0x225   :  { %553 = vsyncpa [#allocation3], 1 }
 0x226   :  { %555 = vsyncpa [#allocation3 + $0x1], 1 }
 0x227   :  { %556 = vsyncpa [#allocation6], 1 }
 0x228   :  { %557 = vsyncpa [#allocation4], 1 }
 0x229   :  { %559 = vsyncpa [#allocation4 + $0x1], 1 }

</bundles_post_ra>
